<compile_context>
chip_gen: v6e
topology: v6e:2x2x1
jax: 0.10.0
libtpu: 0.0.40
codegen_flags: <defaults>
</compile_context>

<pallas_src>
import functools

import jax
import jax.numpy as jnp
from jax.experimental import pallas as pl
from jax.experimental.pallas import tpu as pltpu

SIZE_IN = 9
SIZE1 = 50
SIZE2 = 30
SIZE3 = 10
SIZE_OUT = 1

# Sublane-aligned (multiple of 8) padded feature widths; batch lives on lanes.
IN_PAD = 16
H1_PAD = 64
H2_PAD = 32
H3_PAD = 16
OUT_PAD = 8


def _round_up(n, m):
    return ((n + m - 1) // m) * m


# --------------------------------------------------------------------------- #
# Kernel: one batch tile (batch on lanes) through the whole pre-sampled MLP.
#   x_ref : (IN_PAD, tb)          w*_ref : (out_pad, in_pad)   b*_ref : (out_pad, 1)
#   out_ref: (OUT_PAD, tb)
# --------------------------------------------------------------------------- #
def bayesian_regressor_kernel(
    x_ref,
    w1_ref, b1_ref,
    w2_ref, b2_ref,
    w3_ref, b3_ref,
    w4_ref, b4_ref,
    out_ref,
):
    h = x_ref[...]                                                       # (16, tb)

    h = jnp.dot(w1_ref[...], h, preferred_element_type=jnp.float32)     # (64, tb)
    h = jnp.maximum(h + b1_ref[...], 0.0)

    h = jnp.dot(w2_ref[...], h, preferred_element_type=jnp.float32)     # (32, tb)
    h = jnp.maximum(h + b2_ref[...], 0.0)

    h = jnp.dot(w3_ref[...], h, preferred_element_type=jnp.float32)     # (16, tb)
    h = jnp.maximum(h + b3_ref[...], 0.0)

    y = jnp.dot(w4_ref[...], h, preferred_element_type=jnp.float32)     # (8, tb)
    y = jnp.maximum(y + b4_ref[...], 0.0)

    out_ref[...] = y.astype(out_ref.dtype)


# --------------------------------------------------------------------------- #
# Wrapper: sample Bayesian weights once, zero-pad (torch [out, in] layout is
# kept -> no transposes anywhere), transpose x to batch-in-lanes, tile batch.
# --------------------------------------------------------------------------- #
def _pack_weight(w, out_pad, in_pad):
    """torch [out, in] -> zero-padded [out_pad, in_pad] (layout preserved)."""
    o, i = w.shape
    buf = jnp.zeros((out_pad, in_pad), jnp.float32)
    return buf.at[:o, :i].set(w.astype(jnp.float32))


def _pack_bias(b, out_pad):
    buf = jnp.zeros((out_pad, 1), jnp.float32)
    return buf.at[: b.shape[0], 0].set(b.astype(jnp.float32))


def _sample_and_pack(params):
    sp = jax.nn.softplus  # numerically safe softplus (matches F.softplus intent)
    w1 = params["w1_mu"] + sp(params["w1_rho"]) * params["w1_eps"]   # (50, 9)
    b1 = params["b1_mu"] + sp(params["b1_rho"]) * params["b1_eps"]   # (50,)
    w4 = params["w4_mu"] + sp(params["w4_rho"]) * params["w4_eps"]   # (1, 10)
    b4 = params["b4_mu"] + sp(params["b4_rho"]) * params["b4_eps"]   # (1,)
    return (
        _pack_weight(w1, H1_PAD, IN_PAD), _pack_bias(b1, H1_PAD),
        _pack_weight(params["w2"], H2_PAD, H1_PAD), _pack_bias(params["b2"], H2_PAD),
        _pack_weight(params["w3"], H3_PAD, H2_PAD), _pack_bias(params["b3"], H3_PAD),
        _pack_weight(w4, OUT_PAD, H3_PAD), _pack_bias(b4, OUT_PAD),
    )


def _choose_tiling(batch, block_batch):
    """Pick (tile, padded_batch, num_tiles): lane-aligned (128), waste-bounded,
    and >=2 tiles whenever the batch can be split (so both v7x TCs get work)."""
    num_tiles = max(1, -(-batch // block_batch))      # ceil(B / block_batch)
    if num_tiles == 1 and batch > 128:
        num_tiles = 2
    tb = _round_up(-(-batch // num_tiles), 128)       # round_up(ceil(B/n), 128)
    return tb, tb * num_tiles, num_tiles


@functools.partial(jax.jit, static_argnames=("block_batch",))
def bayesian_regressor_forward(x, params, *, block_batch=1024):
    """x: [B, 9] float32.  params: dict of mu/rho/eps + deterministic weights.
    Returns [B, 1] float32 (matches the PyTorch module's forward)."""
    B = x.shape[0]
    packed = _sample_and_pack(params)

    tb, b_pad, num_tiles = _choose_tiling(B, block_batch)

    # Batch-in-lanes input: (IN_PAD, b_pad), zero-padded features & batch.
    xt = jnp.pad(x.astype(jnp.float32).T, ((0, IN_PAD - SIZE_IN), (0, b_pad - B)))

    const_idx = lambda i: (0, 0)  # parameters: same block every step (VMEM-resident)

    out_padded = pl.pallas_call(
        bayesian_regressor_kernel,
        out_shape=jax.ShapeDtypeStruct((OUT_PAD, b_pad), jnp.float32),
        grid_spec=pltpu.PrefetchScalarGridSpec(
            num_scalar_prefetch=0,
            grid=(num_tiles,),
            in_specs=[
                pl.BlockSpec((IN_PAD, tb), lambda i: (0, i)),      # x^T tile
                pl.BlockSpec((H1_PAD, IN_PAD), const_idx),         # W1 [64, 16]
                pl.BlockSpec((H1_PAD, 1), const_idx),              # b1
                pl.BlockSpec((H2_PAD, H1_PAD), const_idx),         # W2 [32, 64]
                pl.BlockSpec((H2_PAD, 1), const_idx),              # b2
                pl.BlockSpec((H3_PAD, H2_PAD), const_idx),         # W3 [16, 32]
                pl.BlockSpec((H3_PAD, 1), const_idx),              # b3
                pl.BlockSpec((OUT_PAD, H3_PAD), const_idx),        # W4 [8, 16]
                pl.BlockSpec((OUT_PAD, 1), const_idx),             # b4
            ],
            out_specs=pl.BlockSpec((OUT_PAD, tb), lambda i: (0, i)),  # narrow lane-dense out
        ),
        compiler_params=pltpu.CompilerParams(
            dimension_semantics=("parallel",),        # shard batch tiles across TCs (v7x)
            vmem_limit_bytes=32 * 1024 * 1024,        # double-buffered tiles + params << 32 MiB
        ),
    )(xt, *packed)

    # Row 0 of the padded output carries the real scalar prediction per sample.
    return out_padded[:SIZE_OUT, :B].T


# --------------------------------------------------------------------------- #
# Synthetic parameter init (shapes match the PyTorch module) and JAX reference.
# --------------------------------------------------------------------------- #
def init_params(key):
    """mu ~ N(0, 0.1), rho ~ N(rho_init=-3, 0.1), eps ~ N(0, 1);
    deterministic linears use torch-style uniform(-1/sqrt(in), 1/sqrt(in))."""
    ks = jax.random.split(key, 16)
    f32 = jnp.float32
    p = {}
    p["w1_mu"] = 0.1 * jax.random.normal(ks[0], (SIZE1, SIZE_IN), f32)
    p["w1_rho"] = -3.0 + 0.1 * jax.random.normal(ks[1], (SIZE1, SIZE_IN), f32)
    p["w1_eps"] = jax.random.normal(ks[2], (SIZE1, SIZE_IN), f32)
    p["b1_mu"] = 0.1 * jax.random.normal(ks[3], (SIZE1,), f32)
    p["b1_rho"] = -3.0 + 0.1 * jax.random.normal(ks[4], (SIZE1,), f32)
    p["b1_eps"] = jax.random.normal(ks[5], (SIZE1,), f32)
    lim2 = 1.0 / jnp.sqrt(jnp.array(SIZE1, f32))
    p["w2"] = jax.random.uniform(ks[6], (SIZE2, SIZE1), f32, -lim2, lim2)
    p["b2"] = jax.random.uniform(ks[7], (SIZE2,), f32, -lim2, lim2)
    lim3 = 1.0 / jnp.sqrt(jnp.array(SIZE2, f32))
    p["w3"] = jax.random.uniform(ks[8], (SIZE3, SIZE2), f32, -lim3, lim3)
    p["b3"] = jax.random.uniform(ks[9], (SIZE3,), f32, -lim3, lim3)
    p["w4_mu"] = 0.1 * jax.random.normal(ks[10], (SIZE_OUT, SIZE3), f32)
    p["w4_rho"] = -3.0 + 0.1 * jax.random.normal(ks[11], (SIZE_OUT, SIZE3), f32)
    p["w4_eps"] = jax.random.normal(ks[12], (SIZE_OUT, SIZE3), f32)
    p["b4_mu"] = 0.1 * jax.random.normal(ks[13], (SIZE_OUT,), f32)
    p["b4_rho"] = -3.0 + 0.1 * jax.random.normal(ks[14], (SIZE_OUT,), f32)
    p["b4_eps"] = jax.random.normal(ks[15], (SIZE_OUT,), f32)
    return p


def reference_forward(x, p):
    sp = jax.nn.softplus
    w1 = p["w1_mu"] + sp(p["w1_rho"]) * p["w1_eps"]
    b1 = p["b1_mu"] + sp(p["b1_rho"]) * p["b1_eps"]
    h = jax.nn.relu(x @ w1.T + b1)
    h = jax.nn.relu(h @ p["w2"].T + p["b2"])
    h = jax.nn.relu(h @ p["w3"].T + p["b3"])
    w4 = p["w4_mu"] + sp(p["w4_rho"]) * p["w4_eps"]
    b4 = p["b4_mu"] + sp(p["b4_rho"]) * p["b4_eps"]
    return jax.nn.relu(h @ w4.T + b4)


if __name__ == "__main__":
    key = jax.random.PRNGKey(0)
    k_x, k_p = jax.random.split(key)
    batch = 300  # ragged: exercises tile selection (2 tiles of 256) + pad slicing
    x = jax.random.normal(k_x, (batch, SIZE_IN), jnp.float32)
    params = init_params(k_p)

    out = bayesian_regressor_forward(x, params)
    out = jax.block_until_ready(out)

    ref = reference_forward(x, params)
    assert out.shape == (batch, SIZE_OUT), out.shape
    assert jnp.allclose(out, ref, atol=2e-5, rtol=1e-4), float(jnp.max(jnp.abs(out - ref)))
    print("KERNEL_OK")
</pallas_src>

<mosaic_0001>
module attributes {stable_mosaic.version = 11 : i64} {
  func.func @bayesian_regressor_kernel(%arg0: i32, %arg1: memref<16x256xf32, #tpu.memory_space<vmem>>, %arg2: memref<64x16xf32, #tpu.memory_space<vmem>>, %arg3: memref<64x1xf32, #tpu.memory_space<vmem>>, %arg4: memref<32x64xf32, #tpu.memory_space<vmem>>, %arg5: memref<32x1xf32, #tpu.memory_space<vmem>>, %arg6: memref<16x32xf32, #tpu.memory_space<vmem>>, %arg7: memref<16x1xf32, #tpu.memory_space<vmem>>, %arg8: memref<8x16xf32, #tpu.memory_space<vmem>>, %arg9: memref<8x1xf32, #tpu.memory_space<vmem>>, %arg10: memref<8x256xf32, #tpu.memory_space<vmem>>) attributes {dimension_semantics = [#tpu.dimension_semantics<parallel>], iteration_bounds = array<i64: 2>, scalar_prefetch = 0 : i64, scratch_operands = 0 : i64, tpu.core_type = #tpu.core_type<tc>, window_params = [{transform_indices = @transform_0, window_bounds = array<i64: 16, 256>}, {pipeline_mode = #tpu.pipeline_mode<synchronous>, transform_indices = @transform_1, window_bounds = array<i64: 64, 16>}, {pipeline_mode = #tpu.pipeline_mode<synchronous>, transform_indices = @transform_2, window_bounds = array<i64: 64, 1>}, {pipeline_mode = #tpu.pipeline_mode<synchronous>, transform_indices = @transform_3, window_bounds = array<i64: 32, 64>}, {pipeline_mode = #tpu.pipeline_mode<synchronous>, transform_indices = @transform_4, window_bounds = array<i64: 32, 1>}, {pipeline_mode = #tpu.pipeline_mode<synchronous>, transform_indices = @transform_5, window_bounds = array<i64: 16, 32>}, {pipeline_mode = #tpu.pipeline_mode<synchronous>, transform_indices = @transform_6, window_bounds = array<i64: 16, 1>}, {pipeline_mode = #tpu.pipeline_mode<synchronous>, transform_indices = @transform_7, window_bounds = array<i64: 8, 16>}, {pipeline_mode = #tpu.pipeline_mode<synchronous>, transform_indices = @transform_8, window_bounds = array<i64: 8, 1>}, {transform_indices = @transform_9, window_bounds = array<i64: 8, 256>}]} {
    %c0 = arith.constant 0 : index
    %c0_0 = arith.constant 0 : index
    %0 = vector.load %arg1[%c0, %c0_0] : memref<16x256xf32, #tpu.memory_space<vmem>>, vector<16x256xf32>
    %c0_1 = arith.constant 0 : index
    %c0_2 = arith.constant 0 : index
    %1 = vector.load %arg2[%c0_1, %c0_2] : memref<64x16xf32, #tpu.memory_space<vmem>>, vector<64x16xf32>
    %cst = arith.constant dense<0.000000e+00> : vector<64x256xf32>
    %2 = tpu.matmul %1, %0, %cst {dimension_numbers = #tpu.dot_dimension_numbers<[1], [0], [0], [1], [0, 0, 1, 1], [], []>} : vector<64x16xf32>, vector<16x256xf32>, vector<64x256xf32> -> vector<64x256xf32>
    %c0_3 = arith.constant 0 : index
    %c0_4 = arith.constant 0 : index
    %3 = vector.load %arg3[%c0_3, %c0_4] : memref<64x1xf32, #tpu.memory_space<vmem>>, vector<64x1xf32>
    %4 = vector.broadcast %3 : vector<64x1xf32> to vector<64x256xf32>
    %5 = arith.addf %2, %4 : vector<64x256xf32>
    %cst_5 = arith.constant 0.000000e+00 : f32
    %6 = vector.broadcast %cst_5 : f32 to vector<64x256xf32>
    %7 = arith.maximumf %5, %6 : vector<64x256xf32>
    %c0_6 = arith.constant 0 : index
    %c0_7 = arith.constant 0 : index
    %8 = vector.load %arg4[%c0_6, %c0_7] : memref<32x64xf32, #tpu.memory_space<vmem>>, vector<32x64xf32>
    %cst_8 = arith.constant dense<0.000000e+00> : vector<32x256xf32>
    %9 = tpu.matmul %8, %7, %cst_8 {dimension_numbers = #tpu.dot_dimension_numbers<[1], [0], [0], [1], [0, 0, 1, 1], [], []>} : vector<32x64xf32>, vector<64x256xf32>, vector<32x256xf32> -> vector<32x256xf32>
    %c0_9 = arith.constant 0 : index
    %c0_10 = arith.constant 0 : index
    %10 = vector.load %arg5[%c0_9, %c0_10] : memref<32x1xf32, #tpu.memory_space<vmem>>, vector<32x1xf32>
    %11 = vector.broadcast %10 : vector<32x1xf32> to vector<32x256xf32>
    %12 = arith.addf %9, %11 : vector<32x256xf32>
    %cst_11 = arith.constant 0.000000e+00 : f32
    %13 = vector.broadcast %cst_11 : f32 to vector<32x256xf32>
    %14 = arith.maximumf %12, %13 : vector<32x256xf32>
    %c0_12 = arith.constant 0 : index
    %c0_13 = arith.constant 0 : index
    %15 = vector.load %arg6[%c0_12, %c0_13] : memref<16x32xf32, #tpu.memory_space<vmem>>, vector<16x32xf32>
    %cst_14 = arith.constant dense<0.000000e+00> : vector<16x256xf32>
    %16 = tpu.matmul %15, %14, %cst_14 {dimension_numbers = #tpu.dot_dimension_numbers<[1], [0], [0], [1], [0, 0, 1, 1], [], []>} : vector<16x32xf32>, vector<32x256xf32>, vector<16x256xf32> -> vector<16x256xf32>
    %c0_15 = arith.constant 0 : index
    %c0_16 = arith.constant 0 : index
    %17 = vector.load %arg7[%c0_15, %c0_16] : memref<16x1xf32, #tpu.memory_space<vmem>>, vector<16x1xf32>
    %18 = vector.broadcast %17 : vector<16x1xf32> to vector<16x256xf32>
    %19 = arith.addf %16, %18 : vector<16x256xf32>
    %cst_17 = arith.constant 0.000000e+00 : f32
    %20 = vector.broadcast %cst_17 : f32 to vector<16x256xf32>
    %21 = arith.maximumf %19, %20 : vector<16x256xf32>
    %c0_18 = arith.constant 0 : index
    %c0_19 = arith.constant 0 : index
    %22 = vector.load %arg8[%c0_18, %c0_19] : memref<8x16xf32, #tpu.memory_space<vmem>>, vector<8x16xf32>
    %cst_20 = arith.constant dense<0.000000e+00> : vector<8x256xf32>
    %23 = tpu.matmul %22, %21, %cst_20 {dimension_numbers = #tpu.dot_dimension_numbers<[1], [0], [0], [1], [0, 0, 1, 1], [], []>} : vector<8x16xf32>, vector<16x256xf32>, vector<8x256xf32> -> vector<8x256xf32>
    %c0_21 = arith.constant 0 : index
    %c0_22 = arith.constant 0 : index
    %24 = vector.load %arg9[%c0_21, %c0_22] : memref<8x1xf32, #tpu.memory_space<vmem>>, vector<8x1xf32>
    %25 = vector.broadcast %24 : vector<8x1xf32> to vector<8x256xf32>
    %26 = arith.addf %23, %25 : vector<8x256xf32>
    %cst_23 = arith.constant 0.000000e+00 : f32
    %27 = vector.broadcast %cst_23 : f32 to vector<8x256xf32>
    %28 = arith.maximumf %26, %27 : vector<8x256xf32>
    %c0_24 = arith.constant 0 : index
    %c0_25 = arith.constant 0 : index
    %29 = vector.load %arg10[%c0_24, %c0_25] : memref<8x256xf32, #tpu.memory_space<vmem>>, vector<8x256xf32>
    tpu.vector_store %arg10[%c0_24, %c0_25], %28 {strides = array<i32>} : memref<8x256xf32, #tpu.memory_space<vmem>>, vector<8x256xf32>,
    return
  }
  func.func @transform_0(%arg0: i32) -> (i32, i32) {
    %c0_i32 = arith.constant 0 : i32
    %c0_i32_0 = arith.constant 0 : i32
    return %c0_i32, %arg0 : i32, i32
  }
  func.func @transform_1(%arg0: i32) -> (i32, i32) {
    %c0_i32 = arith.constant 0 : i32
    %c0_i32_0 = arith.constant 0 : i32
    %c0_i32_1 = arith.constant 0 : i32
    return %c0_i32, %c0_i32_0 : i32, i32
  }
  func.func @transform_2(%arg0: i32) -> (i32, i32) {
    %c0_i32 = arith.constant 0 : i32
    %c0_i32_0 = arith.constant 0 : i32
    %c0_i32_1 = arith.constant 0 : i32
    return %c0_i32, %c0_i32_0 : i32, i32
  }
  func.func @transform_3(%arg0: i32) -> (i32, i32) {
    %c0_i32 = arith.constant 0 : i32
    %c0_i32_0 = arith.constant 0 : i32
    %c0_i32_1 = arith.constant 0 : i32
    return %c0_i32, %c0_i32_0 : i32, i32
  }
  func.func @transform_4(%arg0: i32) -> (i32, i32) {
    %c0_i32 = arith.constant 0 : i32
    %c0_i32_0 = arith.constant 0 : i32
    %c0_i32_1 = arith.constant 0 : i32
    return %c0_i32, %c0_i32_0 : i32, i32
  }
  func.func @transform_5(%arg0: i32) -> (i32, i32) {
    %c0_i32 = arith.constant 0 : i32
    %c0_i32_0 = arith.constant 0 : i32
    %c0_i32_1 = arith.constant 0 : i32
    return %c0_i32, %c0_i32_0 : i32, i32
  }
  func.func @transform_6(%arg0: i32) -> (i32, i32) {
    %c0_i32 = arith.constant 0 : i32
    %c0_i32_0 = arith.constant 0 : i32
    %c0_i32_1 = arith.constant 0 : i32
    return %c0_i32, %c0_i32_0 : i32, i32
  }
  func.func @transform_7(%arg0: i32) -> (i32, i32) {
    %c0_i32 = arith.constant 0 : i32
    %c0_i32_0 = arith.constant 0 : i32
    %c0_i32_1 = arith.constant 0 : i32
    return %c0_i32, %c0_i32_0 : i32, i32
  }
  func.func @transform_8(%arg0: i32) -> (i32, i32) {
    %c0_i32 = arith.constant 0 : i32
    %c0_i32_0 = arith.constant 0 : i32
    %c0_i32_1 = arith.constant 0 : i32
    return %c0_i32, %c0_i32_0 : i32, i32
  }
  func.func @transform_9(%arg0: i32) -> (i32, i32) {
    %c0_i32 = arith.constant 0 : i32
    %c0_i32_0 = arith.constant 0 : i32
    return %c0_i32, %arg0 : i32, i32
  }
}

</mosaic_0001>

<bundles_post_ra>
// kernel: bayesian_regressor_forward.1
= control target key start
LH: loop header
LB: loop body
LE: loop exit
PB: predicated region body
PF: predicated region fallthrough
CT: control target
= control target key end

     0   :  { %s1095_s30 = smov 0   ;;  %s1097_s10 = smov 0   ;;  %s1261_s0 = inlined_call_operand.vmem [shape: f32[16,512], index: 0, kind: input, shape index: {}]   ;;  %s1262_s1 = inlined_call_operand.vmem [shape: f32[64,16], index: 1, kind: input, shape index: {}]   ;;  %s1263_s2 = inlined_call_operand.vmem [shape: f32[64,1], index: 2, kind: input, shape index: {}]   ;;  %s1264_s3 = inlined_call_operand.vmem [shape: f32[32,64], index: 3, kind: input, shape index: {}]   ;;  %s1265_s4 = inlined_call_operand.vmem [shape: f32[32,1], index: 4, kind: input, shape index: {}]   ;;  %s1266_s5 = inlined_call_operand.vmem [shape: f32[16,32], index: 5, kind: input, shape index: {}]   ;;  %s1267_s6 = inlined_call_operand.vmem [shape: f32[16,1], index: 6, kind: input, shape index: {}]   ;;  %s1268_s7 = inlined_call_operand.vmem [shape: f32[8,16], index: 7, kind: input, shape index: {}]   ;;  %s1269_s8 = inlined_call_operand.vmem [shape: f32[8,1], index: 8, kind: input, shape index: {}]   ;;  %s1270_s9 = inlined_call_operand.vmem [shape: f32[8,512], index: 9, kind: output, shape index: {}]  }
   0x1   :  { %s1099_s11 = smov 0  }
   0x2 LB: > { %s962_s12 = sadd.s32 4294967295, %s1041_s11   ;;  %s1112_s13 = sadd.s32 1, %s1041_s11   ;;  %s1041_s11 = sphi %s1099_s11, %s1273_s11   ;;  %s1037_s10 = sphi %s1097_s10, %s1272_s10   ;;  %s1033_s30 = sphi %s1095_s30, %s1271_s30  }
   0x3   : > { %s23_s14 = ssub.s32 %s1041_s11, %s1112_s13  ;;  %s26_s15 = sadd.s32 1, %s1037_s10 }
   0x4   : > { %p24_p0 = scmp.eq.s32.totalorder %s23_s14, 0  ;;  %p33_p1 = scmp.ne.s32.totalorder %s1037_s10, %s1033_s30 }
   0x5   : > { %p34_p2 = scmp.eq.s32.totalorder %s1041_s11, 0  ;;  %p965_p4 = scmp.ge.s32.totalorder %s1041_s11, 2 }
   0x6   : > { %s1121_s16 = scalar_select %p24_p0, %s1037_s10, %s26_s15  }
   0x7   : > { %p35_p3 = por %p34_p2, %p33_p1  ;;  %277 = sbr.rel (%p965_p4) target bundleno = 18 (0x12), region = 48 }
   0xc   : > { %280 = sbr.rel (!%p35_p3) target bundleno = 18 (0x12), region = 52  ;;  %s282_s17 = sand.u32 (%p35_p3), 1, %s1037_s10  }
   0xd   : > { %s990_s18 = sshll.u32 (%p35_p3), %s1041_s11, 4  ;;  %s966_s19 = sshll.u32 (%p35_p3), %s282_s17, 5 }
   0xe   : > { %s287_s22 = scalar_lea.vmem (%p35_p3), %s1261_s0, %s990_s18  ;;  %s284_s23 = scalar_lea.vmem (%p35_p3), [#allocation2], %s966_s19 }
   0xf   : > { %v300_v0 = vld [vmem:[%s287_s22] sm:$0xff] (%p35_p3)  ;;  %v302_v1 = vld [vmem:[%s287_s22 + $0x8] sm:$0xff] (%p35_p3) }
  0x10   : > { %v304_v2 = vld [vmem:[%s287_s22 + $0x20] sm:$0xff] (%p35_p3)  ;;  %301 = vst [vmem:[%s284_s23] sm:$0xff] (%p35_p3), %v300_v0  ;;  %303 = vst [vmem:[%s284_s23 + $0x8] sm:$0xff] (%p35_p3), %v302_v1  ;;  %v306_v3 = vld [vmem:[%s287_s22 + $0x28] sm:$0xff] (%p35_p3) }
  0x11   : > { %305 = vst [vmem:[%s284_s23 + $0x10] sm:$0xff] %v304_v2  ;;  %307 = vst [vmem:[%s284_s23 + $0x18] sm:$0xff] %v306_v3 }
  0x12 PF: > { %p969_p5 = scmp.ge.s32.totalorder %s1041_s11, 1  ;;  %p312_p6 = scmp.lt.s32.totalorder %s1041_s11, 3 }
  0x14   : > { %p313_p7 = pnand %p969_p5, %p312_p6 }
  0x15   : > { %s319_s24 = sand.u32 (!%p313_p7), 1, %s1033_s30   ;;  %s971_s23 = sshll.u32 (!%p313_p7), %s962_s12, 1 }
  0x16   : > { %316 = sbr.rel (%p313_p7) target bundleno = 903 (0x387), region = 75  ;;  %s970_s25 = sshll.u32 (!%p313_p7), %s319_s24, 5 }
  0x17   : > { %s321_s28 = scalar_lea.vmem (!%p313_p7), [#allocation2], %s970_s25  ;;  %p356_p8 = scmp.lt.s32.totalorder (!%p313_p7), %s971_s23, 3 }
  0x1b   : > { %v1043_v4 = vmov 0.0   ;;  %v1044_v5 = vmov 0   ;;  %v378_v6 = vld [vmem:[%s1263_s2 + $0x28] sm:$0xff]  ;;  %v364_v7 = vld [vmem:[%s321_s28 + $0x18] sm:$0xff]  ;;  %v363_v8 = vld [vmem:[%s321_s28 + $0x10] sm:$0xff]  ;;  %vm421_vm0 = vcmask 130048  }
  0x1c   : > { %510 = vmatprep.mubr.f32.mxu0 %v1043_v4  ;;  %680 = vmatprep.mubr.f32.mxu1 %v1043_v4  ;;  %v362_v9 = vld [vmem:[%s321_s28 + $0x8] sm:$0xff]  ;;  %v361_v10 = vld [vmem:[%s321_s28] sm:$0xff]  ;;  %v380_v11 = vld [vmem:[%s1263_s2 + $0x38] sm:$0xff]  ;;  %vm603_vm1 = vcmask 523264   ;;  %vm727_vm2 = vcmask 261120   ;;  %s1275_s23 = smov (!%p356_p8, %s971_s23), 3 }
  0x1d   : > { %1018 = vset.pattern.permute.xlu1 %v1044_v5  ;;  %1017 = vset.pattern.permute.xlu0 %v1044_v5  ;;  %v377_v12 = vld [vmem:[%s1263_s2 + $0x20] sm:$0xff]  ;;  %v379_v14 = vld [vmem:[%s1263_s2 + $0x30] sm:$0xff]  ;;  %v366_v16 = vld [vmem:[%s1262_s1 + $0x8] sm:$0xff]  ;;  %s972_s24 = sshll.u32 %s1275_s23, 3 }
  0x1e   : > { %408 = vperm.xlu1 %1018, %v378_v6   ;;  %474 = vmatprep.subr.mxu0 %v364_v7  ;;  %v365_v13 = vld [vmem:[%s1262_s1] sm:$0xff]  ;;  %v375_v15 = vld [vmem:[%s1263_s2 + $0x10] sm:$0xff]  ;;  %v376_v17 = vld [vmem:[%s1263_s2 + $0x18] sm:$0xff]  ;;  %s359_s27 = scalar_lea.vmem %s1270_s9, %s972_s24 }
  0x1f   : > { %475 = vmatpush1.msra.mxu0 %v363_v8  ;;  %418 = vperm.xlu0 %1017, %v380_v11   ;;  %v373_v18 = vld [vmem:[%s1263_s2] sm:$0xff]  ;;  %v367_v19 = vld [vmem:[%s1262_s1 + $0x10] sm:$0xff]  ;;  %v374_v20 = vld [vmem:[%s1263_s2 + $0x8] sm:$0xff] }
  0x20   : > { %476 = vmatprep.subr.mxu0 %v362_v9  ;;  %v581_v21 = vld [vmem:[%s1265_s4 + $0x10] sm:$0xff]  ;;  %v368_v22 = vld [vmem:[%s1262_s1 + $0x18] sm:$0xff]  ;;  %v579_v24 = vld [vmem:[%s1265_s4] sm:$0xff] }
  0x21   : > { %477 = vmatpush1.msra.mxu0 %v361_v10  ;;  %v582_v23 = vld [vmem:[%s1265_s4 + $0x18] sm:$0xff]  ;;  %v369_v25 = vld [vmem:[%s1262_s1 + $0x20] sm:$0xff]  ;;  %v580_v26 = vld [vmem:[%s1265_s4 + $0x8] sm:$0xff] }
  0x22   : > { %403 = vperm.xlu1 %1018, %v377_v12   ;;  %973 = vmatmul.mubr.msk.f32.vlgmr.msra.gmra.mxu0 %vm421_vm0, %v365_v13  ;;  %v715_v27 = vld [vmem:[%s1267_s6] sm:$0xff]  ;;  %v370_v28 = vld [vmem:[%s1262_s1 + $0x28] sm:$0xff]  ;;  %v371_v30 = vld [vmem:[%s1262_s1 + $0x30] sm:$0xff] }
  0x23   : > { %516 = vmatprep.mubr.f32.mxu0 %v1043_v4  ;;  %413 = vperm.xlu0 %1017, %v379_v14   ;;  %v716_v29 = vld [vmem:[%s1267_s6 + $0x8] sm:$0xff]  ;;  %v816_v31 = vld [vmem:[%s1269_s8] sm:$0xff]  ;;  %v372_v32 = vld [vmem:[%s1262_s1 + $0x38] sm:$0xff] }
  0x26   : > { %393 = vperm.xlu1 %1018, %v375_v15   ;;  %974 = vmatmul.mubr.msk.f32.gmra.mxu0 %vm421_vm0, %v366_v16 }
  0x27   : > { %522 = vmatprep.mubr.f32.mxu0 %v1043_v4  ;;  %398 = vperm.xlu0 %1017, %v376_v17  }
  0x2a   : > { %383 = vperm.xlu1 %1018, %v373_v18   ;;  %975 = vmatmul.mubr.msk.f32.gmra.mxu0 %vm421_vm0, %v367_v19 }
  0x2b   : > { %528 = vmatprep.mubr.f32.mxu0 %v1043_v4  ;;  %388 = vperm.xlu0 %1017, %v374_v20  }
  0x2e   : > { %595 = vperm.xlu1 %1018, %v581_v21   ;;  %976 = vmatmul.mubr.msk.f32.gmra.mxu0 %vm421_vm0, %v368_v22 }
  0x2f   : > { %534 = vmatprep.mubr.f32.mxu0 %v1043_v4  ;;  %600 = vperm.xlu0 %1017, %v582_v23  }
  0x32   : > { %585 = vperm.xlu1 %1018, %v579_v24   ;;  %977 = vmatmul.mubr.msk.f32.gmra.mxu0 %vm421_vm0, %v369_v25 }
  0x33   : > { %540 = vmatprep.mubr.f32.mxu0 %v1043_v4  ;;  %590 = vperm.xlu0 %1017, %v580_v26   ;;  %v575_v26 = vld [vmem:[%s1264_s3] sm:$0xff] }
  0x36   : > { %719 = vperm.xlu1 %1018, %v715_v27   ;;  %978 = vmatmul.mubr.msk.f32.gmra.mxu0 %vm421_vm0, %v370_v28  ;;  %v576_v27 = vld [vmem:[%s1264_s3 + $0x8] sm:$0xff]  ;;  %v577_v28 = vld [vmem:[%s1264_s3 + $0x10] sm:$0xff] }
  0x37   : > { %546 = vmatprep.mubr.f32.mxu0 %v1043_v4  ;;  %724 = vperm.xlu0 %1017, %v716_v29   ;;  %v578_v29 = vld [vmem:[%s1264_s3 + $0x18] sm:$0xff] }
  0x3a   : > { %979 = vmatmul.mubr.msk.f32.gmra.mxu0 %vm421_vm0, %v371_v30 }
  0x3b   : > { %552 = vmatprep.mubr.f32.mxu0 %v1043_v4  ;;  %819 = vperm.xlu0 %1017, %v816_v31  }
  0x3e   : > { %980 = vmatmul.mubr.msk.f32.gmra.mxu0 %vm421_vm0, %v372_v32 }
  0x3f   : > { %889 = vmatprep.mubr.f32.mxu0 %v1043_v4 }
  0x99   : > { %v409_v46 = vpop.permute.xlu1 %408 }
  0x9a   : > { %v419_v44 = vpop.permute.xlu0 %418 }
  0x9d   : > { %v404_v51 = vpop.permute.xlu1 %403 }
  0x9e   : > { %v414_v49 = vpop.permute.xlu0 %413 }
  0xa1   : > { %v394_v62 = vpop.permute.xlu1 %393 }
  0xa2   : > { %v399_v57 = vpop.permute.xlu0 %398 }
  0xa5   : > { %v384_v13 = vpop.permute.xlu1 %383 }
  0xa6   : > { %v389_v8 = vpop.permute.xlu0 %388 }
  0xe2   : > { %v512_v33 = vpop.f32.mrf.mxu0 }
  0xe3   : > { %v513_v20 = vadd.f32 %v512_v33, %v384_v13 }
  0xe4   : > { %v514_v34 = vpop.f32.mrf.mxu0 }
  0xe5   : > { %v515_v18 = vadd.f32 %v514_v34, %v384_v13  ;;  %v559_v25 = vmax.f32 %v513_v20, 0.0 }
  0xe6   : > { %v518_v35 = vpop.f32.mrf.mxu0 }
  0xe7   : > { %v519_v16 = vadd.f32 %v518_v35, %v389_v8  ;;  %v560_v24 = vmax.f32 %v515_v18, 0.0  ;;  %v601_v35 = vpop.permute.xlu0 %600 }
  0xe8   : > { %v520_v36 = vpop.f32.mrf.mxu0 }
  0xe9   : > { %v521_v14 = vadd.f32 %v520_v36, %v389_v8  ;;  %v561_v23 = vmax.f32 %v519_v16, 0.0 }
  0xea   : > { %v524_v37 = vpop.f32.mrf.mxu0 }
  0xeb   : > { %v525_v11 = vadd.f32 %v524_v37, %v394_v62  ;;  %v562_v22 = vmax.f32 %v521_v14, 0.0  ;;  %v596_v37 = vpop.permute.xlu1 %595 }
  0xec   : > { %v526_v38 = vpop.f32.mrf.mxu0 }
  0xed   : > { %v527_v9 = vadd.f32 %v526_v38, %v394_v62  ;;  %v563_v21 = vmax.f32 %v525_v11, 0.0 }
  0xee   : > { %v530_v39 = vpop.f32.mrf.mxu0 }
  0xef   : > { %v531_v6 = vadd.f32 %v530_v39, %v399_v57  ;;  %v564_v19 = vmax.f32 %v527_v9, 0.0 }
  0xf0   : > { %v532_v40 = vpop.f32.mrf.mxu0 }
  0xf1   : > { %v533_v3 = vadd.f32 %v532_v40, %v399_v57  ;;  %v565_v17 = vmax.f32 %v531_v6, 0.0 }
  0xf2   : > { %v536_v41 = vpop.f32.mrf.mxu0 }
  0xf3   : > { %v537_v1 = vadd.f32 %v536_v41, %v404_v51  ;;  %v566_v15 = vmax.f32 %v533_v3, 0.0 }
  0xf4   : > { %v538_v42 = vpop.f32.mrf.mxu0 }
  0xf5   : > { %v539_v63 = vadd.f32 %v538_v42, %v404_v51  ;;  %v567_v12 = vmax.f32 %v537_v1, 0.0 }
  0xf6   : > { %v542_v43 = vpop.f32.mrf.mxu0 }
  0xf7   : > { %v543_v60 = vadd.f32 %v542_v43, %v409_v46  ;;  %v568_v10 = vmax.f32 %v539_v63, 0.0  ;;  %v591_v43 = vpop.permute.xlu0 %590 }
  0xf8   : > { %v544_v45 = vpop.f32.mrf.mxu0 }
  0xf9   : > { %v545_v58 = vadd.f32 %v544_v45, %v409_v46  ;;  %v569_v7 = vmax.f32 %v543_v60, 0.0 }
  0xfa   : > { %v548_v47 = vpop.f32.mrf.mxu0 }
  0xfb   : > { %v549_v56 = vadd.f32 %v548_v47, %v414_v49  ;;  %v570_v5 = vmax.f32 %v545_v58, 0.0  ;;  %v586_v47 = vpop.permute.xlu1 %585  ;;  %v713_v58 = vld [vmem:[%s1266_s5] sm:$0xff]  ;;  %v725_v63 = vpop.permute.xlu0 %724 }
  0xfc   : > { %v550_v48 = vpop.f32.mrf.mxu0 }
  0xfd   : > { %v551_v54 = vadd.f32 %v550_v48, %v414_v49  ;;  %v571_v2 = vmax.f32 %v549_v56, 0.0 }
  0xfe   : > { %v554_v50 = vpop.f32.mrf.mxu0 }
  0xff   : > { %v555_v52 = vadd.f32 %v554_v50, %v419_v44  ;;  %v572_v0 = vmax.f32 %v551_v54, 0.0  ;;  %v820_v11 = vpop.permute.xlu0 %819 }
 0x100   : > { %v556_v53 = vpop.f32.mrf.mxu0 }
 0x101   : > { %v557_v55 = vadd.f32 %v556_v53, %v419_v44  ;;  %v573_v61 = vmax.f32 %v555_v52, 0.0 }
 0x103   : > { %v574_v59 = vmax.f32 %v557_v55, 0.0 }
 0x105   : > { %632 = vmatprep.subr.mxu1 %v574_v59  ;;  %v714_v59 = vld [vmem:[%s1266_s5 + $0x8] sm:$0xff] }
 0x106   : > { %633 = vmatpush1.msra.mxu1 %v573_v61 }
 0x107   : > { %634 = vmatprep.subr.mxu1 %v572_v0  ;;  %v720_v0 = vpop.permute.xlu1 %719 }
 0x108   : > { %635 = vmatpush1.msra.mxu1 %v571_v2 }
 0x109   : > { %636 = vmatprep.subr.mxu1 %v570_v5 }
 0x10a   : > { %637 = vmatpush1.msra.mxu1 %v569_v7 }
 0x10b   : > { %638 = vmatprep.subr.mxu1 %v568_v10  ;;  %v815_v10 = vld [vmem:[%s1268_s7] sm:$0xff] }
 0x10c   : > { %639 = vmatpush1.msra.mxu1 %v567_v12 }
 0x10d   : > { %640 = vmatprep.subr.mxu1 %v566_v15 }
 0x10e   : > { %641 = vmatpush1.msra.mxu1 %v565_v17 }
 0x10f   : > { %642 = vmatprep.subr.mxu1 %v564_v19 }
 0x110   : > { %643 = vmatpush1.msra.mxu1 %v563_v21 }
 0x111   : > { %644 = vmatprep.subr.mxu1 %v562_v22 }
 0x112   : > { %645 = vmatpush1.msra.mxu1 %v561_v23 }
 0x113   : > { %646 = vmatprep.subr.mxu1 %v560_v24 }
 0x114   : > { %647 = vmatpush1.msra.mxu1 %v559_v25 }
 0x115   : > { %981 = vmatmul.mubr.msk.f32.vlgmr.msra.gmra.mxu1 %vm603_vm1, %v575_v26 }
 0x116   : > { %686 = vmatprep.mubr.f32.mxu1 %v1043_v4 }
 0x119   : > { %982 = vmatmul.mubr.msk.f32.gmra.mxu1 %vm603_vm1, %v576_v27 }
 0x11a   : > { %692 = vmatprep.mubr.f32.mxu1 %v1043_v4 }
 0x11d   : > { %983 = vmatmul.mubr.msk.f32.gmra.mxu1 %vm603_vm1, %v577_v28 }
 0x11e   : > { %698 = vmatprep.mubr.f32.mxu1 %v1043_v4 }
 0x121   : > { %984 = vmatmul.mubr.msk.f32.gmra.mxu1 %vm603_vm1, %v578_v29 }
 0x122   : > { %798 = vmatprep.mubr.f32.mxu1 %v1043_v4 }
 0x1d5   : > { %v682_v30 = vpop.f32.mrf.mxu1 }
 0x1d6   : > { %v683_v52 = vadd.f32 %v682_v30, %v586_v47 }
 0x1d7   : > { %v684_v31 = vpop.f32.mrf.mxu1 }
 0x1d8   : > { %v685_v50 = vadd.f32 %v684_v31, %v586_v47  ;;  %v705_v57 = vmax.f32 %v683_v52, 0.0 }
 0x1d9   : > { %v688_v32 = vpop.f32.mrf.mxu1 }
 0x1da   : > { %v689_v48 = vadd.f32 %v688_v32, %v591_v43  ;;  %v706_v56 = vmax.f32 %v685_v50, 0.0 }
 0x1db   : > { %v690_v33 = vpop.f32.mrf.mxu1 }
 0x1dc   : > { %v691_v45 = vadd.f32 %v690_v33, %v591_v43  ;;  %v707_v55 = vmax.f32 %v689_v48, 0.0 }
 0x1dd   : > { %v694_v34 = vpop.f32.mrf.mxu1 }
 0x1de   : > { %v695_v44 = vadd.f32 %v694_v34, %v596_v37  ;;  %v708_v54 = vmax.f32 %v691_v45, 0.0 }
 0x1df   : > { %v696_v36 = vpop.f32.mrf.mxu1 }
 0x1e0   : > { %v697_v41 = vadd.f32 %v696_v36, %v596_v37  ;;  %v709_v53 = vmax.f32 %v695_v44, 0.0 }
 0x1e1   : > { %v700_v38 = vpop.f32.mrf.mxu1 }
 0x1e2   : > { %v701_v39 = vadd.f32 %v700_v38, %v601_v35  ;;  %v710_v51 = vmax.f32 %v697_v41, 0.0 }
 0x1e3   : > { %v702_v40 = vpop.f32.mrf.mxu1 }
 0x1e4   : > { %v703_v42 = vadd.f32 %v702_v40, %v601_v35  ;;  %v711_v49 = vmax.f32 %v701_v39, 0.0 }
 0x1e6   : > { %v712_v46 = vmax.f32 %v703_v42, 0.0 }
 0x1e8   : > { %758 = vmatprep.subr.mxu1 %v712_v46 }
 0x1e9   : > { %759 = vmatpush1.msra.mxu1 %v711_v49 }
 0x1ea   : > { %760 = vmatprep.subr.mxu1 %v710_v51 }
 0x1eb   : > { %761 = vmatpush1.msra.mxu1 %v709_v53 }
 0x1ec   : > { %762 = vmatprep.subr.mxu1 %v708_v54 }
 0x1ed   : > { %763 = vmatpush1.msra.mxu1 %v707_v55 }
 0x1ee   : > { %764 = vmatprep.subr.mxu1 %v706_v56 }
 0x1ef   : > { %765 = vmatpush1.msra.mxu1 %v705_v57 }
 0x1f0   : > { %985 = vmatmul.mubr.msk.f32.vlgmr.msra.gmra.mxu1 %vm727_vm2, %v713_v58 }
 0x1f1   : > { %804 = vmatprep.mubr.f32.mxu1 %v1043_v4 }
 0x1f4   : > { %986 = vmatmul.mubr.msk.f32.gmra.mxu1 %vm727_vm2, %v714_v59 }
 0x2b0   : > { %v800_v60 = vpop.f32.mrf.mxu1 }
 0x2b1   : > { %v801_v6 = vadd.f32 %v800_v60, %v720_v0 }
 0x2b2   : > { %v802_v61 = vpop.f32.mrf.mxu1 }
 0x2b3   : > { %v803_v3 = vadd.f32 %v802_v61, %v720_v0  ;;  %v811_v4 = vmax.f32 %v801_v6, 0.0 }
 0x2b4   : > { %v806_v62 = vpop.f32.mrf.mxu1 }
 0x2b5   : > { %v807_v1 = vadd.f32 %v806_v62, %v725_v63  ;;  %v812_v9 = vmax.f32 %v803_v3, 0.0 }
 0x2b6   : > { %v808_v2 = vpop.f32.mrf.mxu1 }
 0x2b7   : > { %v809_v5 = vadd.f32 %v808_v2, %v725_v63  ;;  %v813_v8 = vmax.f32 %v807_v1, 0.0 }
 0x2b9   : > { %v814_v7 = vmax.f32 %v809_v5, 0.0 }
 0x2bb   : > { %853 = vmatprep.subr.mxu0 %v814_v7 }
 0x2bc   : > { %854 = vmatpush1.msra.mxu0 %v813_v8 }
 0x2bd   : > { %855 = vmatprep.subr.mxu0 %v812_v9 }
 0x2be   : > { %856 = vmatpush1.msra.mxu0 %v811_v4 }
 0x2bf   : > { %987 = vmatmul.mubr.msk.f32.vlgmr.msra.gmra.mxu0 %vm421_vm0, %v815_v10 }
 0x37f   : > { %v891_v12 = vpop.f32.mrf.mxu0 }
 0x380   : > { %v892_v13 = vadd.f32 %v891_v12, %v820_v11 }
 0x381   : > { %v893_v14 = vpop.f32.mrf.mxu0 }
 0x382   : > { %v896_v15 = vmax.f32 %v892_v13, 0.0  ;;  %v894_v16 = vadd.f32 %v893_v14, %v820_v11 }
 0x384   : > { %898 = vst [vmem:[%s359_s27] sm:$0xff] %v896_v15  ;;  %v897_v17 = vmax.f32 %v894_v16, 0.0 }
 0x386   : > { %899 = vst [vmem:[%s359_s27 + $0x8] sm:$0xff] %v897_v17 }
 0x387 PF: > { %p16_p9 = scmp.ge.s32.totalorder %s1112_s13, 4   ;;  %s1271_s30 = smov %s1037_s10 }
 0x388   : > { %s1272_s10 = smov %s1121_s16  ;;  %s1273_s11 = smov %s1112_s13 }
 0x389   :  { %18 = sbr.rel (!%p16_p9) target bundleno = 2 (0x2), region = 114 }

</bundles_post_ra>
